<compile_context>
chip_gen: v5e
topology: v5e:2x2
jax: 0.10.0
libtpu: 0.0.40
codegen_flags: <defaults>
</compile_context>

<pallas_src>
import functools

import jax
import jax.numpy as jnp
from jax.experimental import pallas as pl
from jax.experimental.pallas import tpu as pltpu


_INV_SQRT2 = 0.7071067811865476


def _erf_approx(u):
    # Abramowitz & Stegun 7.1.26 rational approximation, max abs err ~1.5e-7.
    p = 0.3275911
    a1, a2, a3, a4, a5 = (0.254829592, -0.284496736, 1.421413741,
                          -1.453152027, 1.061405429)
    au = jnp.abs(u)
    t = 1.0 / (1.0 + p * au)
    poly = ((((a5 * t + a4) * t + a3) * t + a2) * t + a1) * t
    e = 1.0 - poly * jnp.exp(-au * au)
    return jnp.where(u < 0, -e, e)


def _gelu_exact(y):
    # Matches torch.nn.GELU() default (erf form) to ~1e-7.
    return 0.5 * y * (1.0 + _erf_approx(y * _INV_SQRT2))


def _clg_kernel(x_ref, w_ref, g_ref, b_ref, o_ref, *,
                k_size, stride, c_out, feat, eps):
    # x_ref: (C_in, L_pad)   w_ref: (K, C_out, C_in)
    # g_ref/b_ref: (1, feat) o_ref: (C_out, feat)   (batch dim squeezed away)
    acc = jnp.zeros((c_out, feat), jnp.float32)
    for k in range(k_size):                       # static unroll, K is small
        if stride == 1:
            x_k = x_ref[:, pl.ds(k, feat)]
        else:
            x_k = x_ref[:, pl.ds(k, feat, stride=stride)]
        x_k = x_k.astype(jnp.float32)             # (C_in, feat)
        w_k = w_ref[k]                            # (C_out, C_in)
        # Per-tap MXU matmul, f32 accumulate; HIGHEST so f32 math is exact.
        acc = acc + jnp.dot(w_k, x_k,
                            preferred_element_type=jnp.float32,
                            precision=jax.lax.Precision.HIGHEST)

    # LayerNorm over the last (feature) axis -- multiplies only, no divides.
    inv_f = 1.0 / feat
    mean = jnp.sum(acc, axis=-1, keepdims=True) * inv_f
    cen = acc - mean
    var = jnp.sum(cen * cen, axis=-1, keepdims=True) * inv_f
    y = cen * jax.lax.rsqrt(var + eps) * g_ref[...] + b_ref[...]

    o_ref[...] = _gelu_exact(y).astype(o_ref.dtype)


def clg_forward(x, conv_weight, ln_weight, ln_bias, *, stride=1, eps=1e-5):
    """x: (B, C_in, L). conv_weight: (C_out, C_in, K) (PyTorch layout).
    ln_weight/ln_bias: (feature,) with feature == conv output length."""
    B, C_in, L = x.shape
    C_out, C_in_w, K = conv_weight.shape
    assert C_in_w == C_in
    pad = (K - 1) // 2
    L_out = (L + 2 * pad - K) // stride + 1
    feat = ln_weight.shape[0]
    assert feat == L_out, "nn.LayerNorm(feature) must match conv output length"

    # Pure-JAX prep (one cheap pass): pad seq axis, taps to leading axis.
    x_pad = jnp.pad(x, ((0, 0), (0, 0), (pad, pad)))
    L_pad = L + 2 * pad
    w_taps = jnp.transpose(conv_weight, (2, 0, 1)).astype(jnp.float32)  # (K,C_out,C_in)
    gamma = ln_weight.reshape(1, feat).astype(jnp.float32)
    beta = ln_bias.reshape(1, feat).astype(jnp.float32)

    kernel = functools.partial(_clg_kernel, k_size=K, stride=stride,
                               c_out=C_out, feat=feat, eps=eps)

    return pl.pallas_call(
        kernel,
        out_shape=jax.ShapeDtypeStruct((B, C_out, L_out), x.dtype),
        grid_spec=pltpu.PrefetchScalarGridSpec(
            num_scalar_prefetch=0,
            grid=(B,),
            in_specs=[
                # Batch dim squeezed -> kernel sees clean 2-D tiles; blocks
                # equal the full (last-two) array dims so layout rules hold.
                pl.BlockSpec((None, C_in, L_pad), lambda b: (b, 0, 0)),
                # Params: constant index_map -> same block resident every step.
                pl.BlockSpec((K, C_out, C_in), lambda b: (0, 0, 0)),
                pl.BlockSpec((1, feat), lambda b: (0, 0)),
                pl.BlockSpec((1, feat), lambda b: (0, 0)),
            ],
            out_specs=pl.BlockSpec((None, C_out, L_out), lambda b: (b, 0, 0)),
        ),
        compiler_params=pltpu.CompilerParams(
            dimension_semantics=("parallel",)),   # batch shards across TCs on v7x
    )(x_pad, w_taps, gamma, beta)


if __name__ == "__main__":
    # Small shapes implied by the module: batch=2, in_=8, out_=8, seq L=16,
    # kernel_size=3, stride=1 -> L_out=16 -> feature=16.
    B, C_IN, C_OUT, L, K, STRIDE = 2, 8, 8, 16, 3, 1
    PAD = (K - 1) // 2
    FEAT = (L + 2 * PAD - K) // STRIDE + 1

    key = jax.random.PRNGKey(0)
    kx, kw, kg, kb = jax.random.split(key, 4)
    x = jax.random.normal(kx, (B, C_IN, L), dtype=jnp.float32)
    conv_w = jax.random.normal(kw, (C_OUT, C_IN, K), dtype=jnp.float32) * 0.3
    ln_w = jax.random.uniform(kg, (FEAT,), dtype=jnp.float32, minval=0.5, maxval=1.5)
    ln_b = jax.random.normal(kb, (FEAT,), dtype=jnp.float32) * 0.1

    out = clg_forward(x, conv_w, ln_w, ln_b, stride=STRIDE)
    out = jax.block_until_ready(out)

    # Pure-JAX reference (HIGHEST precision so the reference conv is true f32,
    # matching the kernel's high-precision MXU accumulation).
    conv_ref = jax.lax.conv_general_dilated(
        x, conv_w, window_strides=(STRIDE,), padding=[(PAD, PAD)],
        dimension_numbers=("NCH", "OIH", "NCH"),
        precision=jax.lax.Precision.HIGHEST)
    mu = jnp.mean(conv_ref, axis=-1, keepdims=True)
    var = jnp.var(conv_ref, axis=-1, keepdims=True)
    ln_ref = (conv_ref - mu) / jnp.sqrt(var + 1e-5) * ln_w + ln_b
    ref = jax.nn.gelu(ln_ref, approximate=False)

    assert jnp.allclose(out, ref, atol=3e-5, rtol=3e-5), "mismatch vs reference"
    print("KERNEL_OK")
</pallas_src>

<mosaic_0001>
module attributes {stable_mosaic.version = 11 : i64} {
  func.func @_clg_kernel(%arg0: i32, %arg1: memref<1x8x18xf32, #tpu.memory_space<vmem>>, %arg2: memref<3x8x8xf32, #tpu.memory_space<vmem>>, %arg3: memref<1x16xf32, #tpu.memory_space<vmem>>, %arg4: memref<1x16xf32, #tpu.memory_space<vmem>>, %arg5: memref<1x8x16xf32, #tpu.memory_space<vmem>>) attributes {dimension_semantics = [#tpu.dimension_semantics<parallel>], iteration_bounds = array<i64: 2>, scalar_prefetch = 0 : i64, scratch_operands = 0 : i64, tpu.core_type = #tpu.core_type<tc>, window_params = [{transform_indices = @transform_0, window_bounds = array<i64: 1, 8, 18>}, {pipeline_mode = #tpu.pipeline_mode<synchronous>, transform_indices = @transform_1, window_bounds = array<i64: 3, 8, 8>}, {pipeline_mode = #tpu.pipeline_mode<synchronous>, transform_indices = @transform_2, window_bounds = array<i64: 1, 16>}, {pipeline_mode = #tpu.pipeline_mode<synchronous>, transform_indices = @transform_3, window_bounds = array<i64: 1, 16>}, {transform_indices = @transform_4, window_bounds = array<i64: 1, 8, 16>}]} {
    %cst = arith.constant 0.000000e+00 : f32
    %0 = vector.broadcast %cst : f32 to vector<8x16xf32>
    %c0 = arith.constant 0 : index
    %c0_0 = arith.constant 0 : index
    %c0_1 = arith.constant 0 : index
    %1 = vector.load %arg1[%c0, %c0_0, %c0_1] : memref<1x8x18xf32, #tpu.memory_space<vmem>>, vector<1x8x16xf32>
    %2 = vector.shape_cast %1 : vector<1x8x16xf32> to vector<8x16xf32>
    %c0_2 = arith.constant 0 : index
    %c0_3 = arith.constant 0 : index
    %c0_4 = arith.constant 0 : index
    %3 = vector.load %arg2[%c0_2, %c0_3, %c0_4] : memref<3x8x8xf32, #tpu.memory_space<vmem>>, vector<1x8x8xf32>
    %4 = vector.shape_cast %3 : vector<1x8x8xf32> to vector<8x8xf32>
    %cst_5 = arith.constant dense<0.000000e+00> : vector<8x16xf32>
    %5 = tpu.matmul %4, %2, %cst_5 {dimension_numbers = #tpu.dot_dimension_numbers<[1], [0], [0], [1], [0, 0, 1, 1], [], []>, precision = #tpu.contract_precision<fp32>} : vector<8x8xf32>, vector<8x16xf32>, vector<8x16xf32> -> vector<8x16xf32>
    %6 = arith.addf %0, %5 : vector<8x16xf32>
    %c0_6 = arith.constant 0 : index
    %c0_7 = arith.constant 0 : index
    %c1 = arith.constant 1 : index
    %7 = vector.load %arg1[%c0_6, %c0_7, %c1] : memref<1x8x18xf32, #tpu.memory_space<vmem>>, vector<1x8x16xf32>
    %8 = vector.shape_cast %7 : vector<1x8x16xf32> to vector<8x16xf32>
    %c1_8 = arith.constant 1 : index
    %c0_9 = arith.constant 0 : index
    %c0_10 = arith.constant 0 : index
    %9 = vector.load %arg2[%c1_8, %c0_9, %c0_10] : memref<3x8x8xf32, #tpu.memory_space<vmem>>, vector<1x8x8xf32>
    %10 = vector.shape_cast %9 : vector<1x8x8xf32> to vector<8x8xf32>
    %cst_11 = arith.constant dense<0.000000e+00> : vector<8x16xf32>
    %11 = tpu.matmul %10, %8, %cst_11 {dimension_numbers = #tpu.dot_dimension_numbers<[1], [0], [0], [1], [0, 0, 1, 1], [], []>, precision = #tpu.contract_precision<fp32>} : vector<8x8xf32>, vector<8x16xf32>, vector<8x16xf32> -> vector<8x16xf32>
    %12 = arith.addf %6, %11 : vector<8x16xf32>
    %c0_12 = arith.constant 0 : index
    %c0_13 = arith.constant 0 : index
    %c2 = arith.constant 2 : index
    %13 = vector.load %arg1[%c0_12, %c0_13, %c2] : memref<1x8x18xf32, #tpu.memory_space<vmem>>, vector<1x8x16xf32>
    %14 = vector.shape_cast %13 : vector<1x8x16xf32> to vector<8x16xf32>
    %c2_14 = arith.constant 2 : index
    %c0_15 = arith.constant 0 : index
    %c0_16 = arith.constant 0 : index
    %15 = vector.load %arg2[%c2_14, %c0_15, %c0_16] : memref<3x8x8xf32, #tpu.memory_space<vmem>>, vector<1x8x8xf32>
    %16 = vector.shape_cast %15 : vector<1x8x8xf32> to vector<8x8xf32>
    %cst_17 = arith.constant dense<0.000000e+00> : vector<8x16xf32>
    %17 = tpu.matmul %16, %14, %cst_17 {dimension_numbers = #tpu.dot_dimension_numbers<[1], [0], [0], [1], [0, 0, 1, 1], [], []>, precision = #tpu.contract_precision<fp32>} : vector<8x8xf32>, vector<8x16xf32>, vector<8x16xf32> -> vector<8x16xf32>
    %18 = arith.addf %12, %17 : vector<8x16xf32>
    %cst_18 = arith.constant dense<0.000000e+00> : vector<8xf32>
    %19 = vector.multi_reduction <add>, %18, %cst_18 [1] : vector<8x16xf32> to vector<8xf32>
    %20 = vector.shape_cast %19 : vector<8xf32> to vector<8x1xf32>
    %cst_19 = arith.constant 6.250000e-02 : f32
    %21 = vector.broadcast %cst_19 : f32 to vector<8x1xf32>
    %22 = arith.mulf %20, %21 : vector<8x1xf32>
    %23 = vector.broadcast %22 : vector<8x1xf32> to vector<8x16xf32>
    %24 = arith.subf %18, %23 : vector<8x16xf32>
    %25 = arith.mulf %24, %24 : vector<8x16xf32>
    %cst_20 = arith.constant dense<0.000000e+00> : vector<8xf32>
    %26 = vector.multi_reduction <add>, %25, %cst_20 [1] : vector<8x16xf32> to vector<8xf32>
    %27 = vector.shape_cast %26 : vector<8xf32> to vector<8x1xf32>
    %cst_21 = arith.constant 6.250000e-02 : f32
    %28 = vector.broadcast %cst_21 : f32 to vector<8x1xf32>
    %29 = arith.mulf %27, %28 : vector<8x1xf32>
    %cst_22 = arith.constant 9.99999974E-6 : f32
    %30 = vector.broadcast %cst_22 : f32 to vector<8x1xf32>
    %31 = arith.addf %29, %30 : vector<8x1xf32>
    %32 = math.rsqrt %31 : vector<8x1xf32>
    %33 = vector.broadcast %32 : vector<8x1xf32> to vector<8x16xf32>
    %34 = arith.mulf %24, %33 : vector<8x16xf32>
    %c0_23 = arith.constant 0 : index
    %c0_24 = arith.constant 0 : index
    %35 = vector.load %arg3[%c0_23, %c0_24] : memref<1x16xf32, #tpu.memory_space<vmem>>, vector<1x16xf32>
    %36 = vector.broadcast %35 : vector<1x16xf32> to vector<8x16xf32>
    %37 = arith.mulf %34, %36 : vector<8x16xf32>
    %c0_25 = arith.constant 0 : index
    %c0_26 = arith.constant 0 : index
    %38 = vector.load %arg4[%c0_25, %c0_26] : memref<1x16xf32, #tpu.memory_space<vmem>>, vector<1x16xf32>
    %39 = vector.broadcast %38 : vector<1x16xf32> to vector<8x16xf32>
    %40 = arith.addf %37, %39 : vector<8x16xf32>
    %cst_27 = arith.constant 5.000000e-01 : f32
    %41 = vector.broadcast %cst_27 : f32 to vector<8x16xf32>
    %42 = arith.mulf %41, %40 : vector<8x16xf32>
    %cst_28 = arith.constant 0.707106769 : f32
    %43 = vector.broadcast %cst_28 : f32 to vector<8x16xf32>
    %44 = arith.mulf %40, %43 : vector<8x16xf32>
    %45 = math.absf %44 : vector<8x16xf32>
    %cst_29 = arith.constant 0.327591091 : f32
    %46 = vector.broadcast %cst_29 : f32 to vector<8x16xf32>
    %47 = arith.mulf %46, %45 : vector<8x16xf32>
    %cst_30 = arith.constant 1.000000e+00 : f32
    %48 = vector.broadcast %cst_30 : f32 to vector<8x16xf32>
    %49 = arith.addf %48, %47 : vector<8x16xf32>
    %cst_31 = arith.constant 1.000000e+00 : f32
    %50 = vector.broadcast %cst_31 : f32 to vector<8x16xf32>
    %51 = arith.divf %50, %49 : vector<8x16xf32>
    %cst_32 = arith.constant 1.06140542 : f32
    %52 = vector.broadcast %cst_32 : f32 to vector<8x16xf32>
    %53 = arith.mulf %52, %51 : vector<8x16xf32>
    %cst_33 = arith.constant -1.45315206 : f32
    %54 = vector.broadcast %cst_33 : f32 to vector<8x16xf32>
    %55 = arith.addf %53, %54 : vector<8x16xf32>
    %56 = arith.mulf %55, %51 : vector<8x16xf32>
    %cst_34 = arith.constant 1.42141378 : f32
    %57 = vector.broadcast %cst_34 : f32 to vector<8x16xf32>
    %58 = arith.addf %56, %57 : vector<8x16xf32>
    %59 = arith.mulf %58, %51 : vector<8x16xf32>
    %cst_35 = arith.constant -0.284496725 : f32
    %60 = vector.broadcast %cst_35 : f32 to vector<8x16xf32>
    %61 = arith.addf %59, %60 : vector<8x16xf32>
    %62 = arith.mulf %61, %51 : vector<8x16xf32>
    %cst_36 = arith.constant 0.254829586 : f32
    %63 = vector.broadcast %cst_36 : f32 to vector<8x16xf32>
    %64 = arith.addf %62, %63 : vector<8x16xf32>
    %65 = arith.mulf %64, %51 : vector<8x16xf32>
    %cst_37 = arith.constant 0.000000e+00 : f32
    %66 = vector.broadcast %cst_37 : f32 to vector<8x16xf32>
    %67 = arith.subf %66, %45 : vector<8x16xf32>
    %68 = arith.mulf %67, %45 : vector<8x16xf32>
    %69 = math.exp %68 : vector<8x16xf32>
    %70 = arith.mulf %65, %69 : vector<8x16xf32>
    %cst_38 = arith.constant 1.000000e+00 : f32
    %71 = vector.broadcast %cst_38 : f32 to vector<8x16xf32>
    %72 = arith.subf %71, %70 : vector<8x16xf32>
    %cst_39 = arith.constant 0.000000e+00 : f32
    %73 = vector.broadcast %cst_39 : f32 to vector<8x16xf32>
    %74 = arith.cmpf olt, %44, %73 : vector<8x16xf32>
    %cst_40 = arith.constant 0.000000e+00 : f32
    %75 = vector.broadcast %cst_40 : f32 to vector<8x16xf32>
    %76 = arith.subf %75, %72 : vector<8x16xf32>
    %77 = arith.select %74, %76, %72 : vector<8x16xi1>, vector<8x16xf32>
    %cst_41 = arith.constant 1.000000e+00 : f32
    %78 = vector.broadcast %cst_41 : f32 to vector<8x16xf32>
    %79 = arith.addf %78, %77 : vector<8x16xf32>
    %80 = arith.mulf %42, %79 : vector<8x16xf32>
    %c0_42 = arith.constant 0 : index
    %c0_43 = arith.constant 0 : index
    %c0_44 = arith.constant 0 : index
    %81 = vector.load %arg5[%c0_42, %c0_43, %c0_44] : memref<1x8x16xf32, #tpu.memory_space<vmem>>, vector<1x8x16xf32>
    %82 = vector.shape_cast %81 : vector<1x8x16xf32> to vector<8x16xf32>
    %83 = vector.shape_cast %80 : vector<8x16xf32> to vector<1x8x16xf32>
    tpu.vector_store %arg5[%c0_42, %c0_43, %c0_44], %83 {strides = array<i32>} : memref<1x8x16xf32, #tpu.memory_space<vmem>>, vector<1x8x16xf32>,
    return
  }
  func.func @transform_0(%arg0: i32) -> (i32, i32, i32) {
    %c0_i32 = arith.constant 0 : i32
    %c0_i32_0 = arith.constant 0 : i32
    %c0_i32_1 = arith.constant 0 : i32
    return %arg0, %c0_i32, %c0_i32_0 : i32, i32, i32
  }
  func.func @transform_1(%arg0: i32) -> (i32, i32, i32) {
    %c0_i32 = arith.constant 0 : i32
    %c0_i32_0 = arith.constant 0 : i32
    %c0_i32_1 = arith.constant 0 : i32
    %c0_i32_2 = arith.constant 0 : i32
    return %c0_i32, %c0_i32_0, %c0_i32_1 : i32, i32, i32
  }
  func.func @transform_2(%arg0: i32) -> (i32, i32) {
    %c0_i32 = arith.constant 0 : i32
    %c0_i32_0 = arith.constant 0 : i32
    %c0_i32_1 = arith.constant 0 : i32
    return %c0_i32, %c0_i32_0 : i32, i32
  }
  func.func @transform_3(%arg0: i32) -> (i32, i32) {
    %c0_i32 = arith.constant 0 : i32
    %c0_i32_0 = arith.constant 0 : i32
    %c0_i32_1 = arith.constant 0 : i32
    return %c0_i32, %c0_i32_0 : i32, i32
  }
  func.func @transform_4(%arg0: i32) -> (i32, i32, i32) {
    %c0_i32 = arith.constant 0 : i32
    %c0_i32_0 = arith.constant 0 : i32
    %c0_i32_1 = arith.constant 0 : i32
    return %arg0, %c0_i32, %c0_i32_0 : i32, i32, i32
  }
}

</mosaic_0001>

<bundles_post_ra>
// kernel: tpu_custom_call.1
= control target key start
LH: loop header
LB: loop body
LE: loop exit
PB: predicated region body
PF: predicated region fallthrough
CT: control target
= control target key end

     0   :  { %9 = vsyncpa [#allocation3], 0  ;;  %s1261_s0 = inlined_call_operand.hbm [shape: f32[2,8,18], index: 0, kind: input, shape index: {}]   ;;  %s1262_s1 = inlined_call_operand.hbm [shape: f32[3,8,8], index: 1, kind: input, shape index: {}]   ;;  %s1263_s2 = inlined_call_operand.vmem [shape: f32[1,16], index: 2, kind: input, shape index: {}]   ;;  %s1264_s3 = inlined_call_operand.vmem [shape: f32[1,16], index: 3, kind: input, shape index: {}]   ;;  %s1265_s4 = inlined_call_operand.hbm [shape: f32[2,8,16], index: 4, kind: output, shape index: {}]  }
   0x1   :  { %11 = vsyncpa [#allocation3 + $0x1], 0 }
   0x2   :  { %12 = vsyncpa [#allocation6], 0 }
   0x3   :  { %13 = vsyncpa [#allocation4], 0 }
   0x4   :  { %15 = vsyncpa [#allocation4 + $0x1], 0  ;;  %s1109_s15 = smov 0   ;;  %s1111_s16 = smov 0  }
   0x5   :  { %s1113_s17 = smov 0   ;;  %s1115_s18 = smov 0  }
   0x6 LB: > { %s152_s21 = sshll.u32 %s1262_s1, 4  ;;  %s1133_s22 = sadd.s32 4294967295, %s1077_s18   ;;  %s1077_s18 = sphi %s1115_s18, %s1275_s18   ;;  %s1073_s17 = sphi %s1113_s17, %s1274_s17   ;;  %s1069_s16 = sphi %s1111_s16, %s1273_s16   ;;  %s1065_s15 = sphi %s1109_s15, %s1272_s15   ;;  %s153_s21 = int_to_ptr.hbm [resolvable:$true] %s152_s21 }
   0x7   : > { %p865_p0 = scmp.ge.s32.totalorder %s1077_s18, 1  ;;  %p42_p1 = scmp.eq.s32.totalorder %s1133_s22, 0 }
   0x8   : > { %p141_p2 = scmp.lt.s32.totalorder %s1077_s18, 3  ;;  %s1079_s24 = smov [#allocation5]  }
   0x9   : > { %s154_s25 = sshll.u32 %s1079_s24, 4  ;;  %s1080_s26 = smov 128   ;;  %s155_s25 = int_to_ptr.vmem [resolvable:$true] %s154_s25 }
   0xa   : > { %p1138_p3 = pnand %p865_p0, %p141_p2  ;;  %s1081_s27 = smov 8  }
   0xb   : > { %s864_s28 = sadd.s32 4294967294, %s1077_s18   ;;  %s1149_s29 = sadd.s32 1, %s1077_s18  }
   0xc   : > { %p886_p4 = pneg %p1138_p3  ;;  %s28_s30 = sadd.s32 1, %s1073_s17 }
   0xd   : > { %s25_s5 = ssub.s32 %s1077_s18, %s1149_s29  ;;  %p35_p7 = scmp.ne.s32.totalorder %s1073_s17, %s1069_s16 }
   0xe   : > { %p887_p6 = pnand %p886_p4, %p42_p1  ;;  %p26_p8 = scmp.eq.s32.totalorder %s25_s5, 0 }
   0xf   : > { %p36_p9 = scmp.eq.s32.totalorder %s1077_s18, 0  ;;  %p41_p10 = scmp.ne.s32.totalorder %s1069_s16, %s1065_s15 }
  0x10   : > { %889 = dma.hbm_to_vmem [thread:$0]  (!%p887_p6), %s153_s21, 384, %s155_s25, [#allocation6], %s1080_s26, %s1080_s26, %s1081_s27  }
  0x11   : > { %p128_p11 = scmp.eq.s32.totalorder %s1133_s22, 1  ;;  %p1165_p12 = por %p42_p1, %p41_p10 }
  0x12   : > { %s1161_s6 = scalar_select %p26_p8, %s1073_s17, %s28_s30  }
  0x13   : > { %p1169_p13 = por %p128_p11, %p35_p7  ;;  %p134_p0 = scmp.eq.s32.totalorder %s864_s28, 1 }
  0x14   : > { %p37_p2 = por %p36_p9, %p35_p7  ;;  %s174_s9 = sand.u32 1, %s1073_s17  }
  0x15   : > { %p1174_p4 = por %p134_p0, %p41_p10  ;;  %p899_p6 = scmp.lt.s32.totalorder %s1077_s18, 2 }
  0x16   : > { %s868_s11 = sshll.u32 %s174_s9, 3  ;;  %s869_s12 = sshll.u32 %s1077_s18, 3 }
  0x17   : > { %s182_s19 = scalar_lea.hbm %s1261_s0, %s869_s12  ;;  %s178_s21 = scalar_lea.vmem [#allocation2], %s868_s11 }
  0x18   : > { %s184_s20 = sshll.u32 %s182_s19, 4  ;;  %s186_s24 = sshll.u32 %s178_s21, 4  ;;  %s185_s20 = int_to_ptr.hbm [resolvable:$true] %s184_s20  ;;  %s187_s24 = int_to_ptr.vmem [resolvable:$true] %s186_s24 }
  0x19   : > { %p1183_p8 = pnand %p899_p6, %p37_p2  ;;  %s175_s26 = scalar_lea.sflag [#allocation3], %s174_s9 }
  0x1a   : > { %s977_s27 = sshra.s32 %s185_s20, 4  ;;  %s984_s11 = scalar_lea.hbm %s1261_s0, 16  ;;  %s978_s27 = int_to_ptr.hbm [resolvable:$true] %s977_s27 }
  0x1b   : > { %s979_s28 = scalar_lea.hbm %s978_s27, 8  ;;  %p981_p9 = pneg %p1183_p8 }
  0x1c   : > { %p980_p7 = scmp.ne.s32.totalorder %s978_s27, %s979_s28  ;;  %p985_p0 = scmp.lt.s32.totalorder %s978_s27, %s1261_s0 }
  0x1d   : > { %p986_p2 = scmp.lt.s32.totalorder %s984_s11, %s979_s28 }
  0x1e   : > { %p982_p10 = pnand %p981_p9, %p980_p7 }
  0x1f   : > { %p987_p6 = por %p986_p2, %p985_p0 }
  0x20   : > { %p983_p11 = pneg %p982_p10 }
  0x22   : > { %p988_p5 = pnand %p987_p6, %p983_p11 }
  0x24   : > { %991 = shalt.err (!%p988_p5)
}
  0x25   : > { %893 = dma.hbm_to_vmem [thread:$0]  (!%p1183_p8), %s185_s20, 128, %s187_s24, %s175_s26  }
  0x26   : > { %195 = sbr.rel (%p1138_p3) target bundleno = 660 (0x294), region = 36  ;;  %s1200_s9 = sand.u32 (!%p1138_p3), 1, %s1069_s16  }
  0x27   : > { %s871_s14 = sshll.u32 (!%p1138_p3), %s1200_s9, 3  ;;  %s198_s19 = scalar_lea.sflag (!%p1138_p3), [#allocation3], %s1200_s9 }
  0x28   : > { %s201_s21 = scalar_lea.vmem (!%p1138_p3), [#allocation2], %s871_s14 }
  0x2b   : > { %1052 = dma.done.wait (%p1165_p12), %s198_s19, 128  }
  0x2c   : > { %1054 = vsyncadd (%p1165_p12), %s198_s19, 4294967168 }
  0x2d   : > { %1056 = dma.done.wait (%p42_p1), [#allocation6], 384  }
  0x2e   : > { %1058 = vsyncadd (%p42_p1), [#allocation6], 4294966912  ;;  %v232_v0 = vld [vmem:[%s201_s21] sm:$0xff]  ;;  %s1082_s23 = smov 127   ;;  %s1083_s20 = smov 126   ;;  %v235_v1 = vld [vmem:[#allocation5 + $0x8] sm:$0xff] }
  0x2f   : > { %237 = vrot.lane.b32.xlu0 %v232_v0, %s1082_s23  ;;  %vm240_vm0 = vcmask 64512   ;;  %v408_v4 = vand.u32 4294901760, %v232_v0  ;;  %v233_v6 = vld [vmem:[#allocation5] sm:$0xff]  ;;  %v540_v20 = vld [vmem:[#allocation5 + $0x10] sm:$0xff]  ;;  %vm694_vm1 = vcmask 130048   ;;  %s875_s27 = sshll.u32 %s1133_s22, 3 }
  0x30   : > { %v242_v2 = vsel %vm240_vm0, %v235_v1, 0  ;;  %v391_v8 = vsel %vm240_vm0, %v233_v6, 0  ;;  %v545_v23 = vsel %vm240_vm0, %v540_v20, 0  ;;  %s779_s5 = scalar_lea.hbm %s1265_s4, %s875_s27  ;;  %s231_s11 = scalar_lea.vmem [#allocation7], %s871_s14 }
  0x31   : > { %v261_v3 = vand.u32 4294901760, %v242_v2  ;;  %v435_v7 = vsub.f32 %v232_v0, %v408_v4  ;;  %v410_v11 = vand.u32 4294901760, %v391_v8  ;;  %v564_v27 = vand.u32 4294901760, %v545_v23  ;;  %s781_s12 = sshll.u32 %s231_s11, 4  ;;  %s783_s13 = sshll.u32 %s779_s5, 4  ;;  %s782_s12 = int_to_ptr.vmem [resolvable:$true] %s781_s12  ;;  %s784_s13 = int_to_ptr.hbm [resolvable:$true] %s783_s13 }
  0x32   : > { %s769_s22 = scalar_lea.sflag [#allocation4], %s1200_s9  ;;  %s1021_s19 = sshra.s32 %s784_s13, 4  ;;  %s1022_s19 = int_to_ptr.hbm [resolvable:$true] %s1021_s19 }
  0x33   : > { %v262_v5 = vsub.f32 %v242_v2, %v261_v3  ;;  %v436_v10 = vand.u32 4294901760, %v435_v7  ;;  %v411_v14 = vsub.f32 %v391_v8, %v410_v11  ;;  %v565_v32 = vsub.f32 %v545_v23, %v564_v27  ;;  %s1023_s21 = scalar_lea.hbm %s1022_s19, 8  ;;  %s1027_s14 = scalar_lea.hbm %s1265_s4, 16 }
  0x34   : > { %p1024_p1 = scmp.ne.s32.totalorder %s1022_s19, %s1023_s21  ;;  %p1028_p12 = scmp.lt.s32.totalorder %s1022_s19, %s1265_s4 }
  0x35   : > { %v263_v9 = vand.u32 4294901760, %v262_v5  ;;  %v437_v13 = vsub.f32 %v435_v7, %v436_v10  ;;  %v412_v19 = vand.u32 4294901760, %v411_v14  ;;  %v566_v35 = vand.u32 4294901760, %v565_v32  ;;  %p1029_p8 = scmp.lt.s32.totalorder %s1027_s14, %s1023_s21 }
  0x36   : > { %p1025_p3 = pnand %p1024_p1, %p1169_p13 }
  0x37   : > { %541 = vrot.lane.b32.xlu0 %v232_v0, %s1083_s20  ;;  %v264_v12 = vsub.f32 %v262_v5, %v263_v9  ;;  %v438_v18 = vand.u32 4294901760, %v437_v13  ;;  %v413_v24 = vsub.f32 %v411_v14, %v412_v19  ;;  %v567_v37 = vsub.f32 %v565_v32, %v566_v35  ;;  %p1030_p7 = por %p1029_p8, %p1028_p12 }
  0x38   : > { %p1026_p5 = pneg %p1025_p3 }
  0x39   : > { %v265_v16 = vand.u32 4294901760, %v264_v12  ;;  %v414_v30 = vand.u32 4294901760, %v413_v24  ;;  %v568_v38 = vand.u32 4294901760, %v567_v37 }
  0x3a   : > { %p1031_p9 = pnand %p1030_p7, %p1026_p5 }
  0xa1   : > { %v238_v15 = vpop.permute.xlu0 %237 }
  0xa2   : > { %v259_v17 = vand.u32 4294901760, %v238_v15 }
  0xa4   : > { %v286_v21 = vsub.f32 %v238_v15, %v259_v17  ;;  %260 = vmatpush.msra.mxu0 %v259_v17  ;;  %336 = vmatpush.msra.mxu3 %v259_v17 }
  0xa5   : > { %266 = vmatmul.f32.vlgmr.msra.gmra.mxu0 %v265_v16  ;;  %340 = vmatmul.f32.vlgmr.msra.gmra.mxu3 %v263_v9 }
  0xa6   : > { %313 = vmatpush.msra.mxu2 %v286_v21  ;;  %v287_v22 = vand.u32 4294901760, %v286_v21  ;;  %439 = vmatpush.msrb.mxu3 %v438_v18 }
  0xa7   : > { %316 = vmatmul.f32.vlgmr.msra.gmra.mxu2 %v262_v5 }
  0xa8   : > { %533 = vmatpush.msra.mxu3 %v408_v4  ;;  %362 = vmatpush.msrb.mxu0 %v287_v22  ;;  %v288_v25 = vsub.f32 %v286_v21, %v287_v22 }
  0xa9   : > { %409 = vmatpush.msrb.mxu2 %v408_v4  ;;  %v542_v26 = vpop.permute.xlu0 %541 }
  0xaa   : > { %462 = vmatpush.msra.mxu0 %v435_v7  ;;  %v289_v28 = vand.u32 4294901760, %v288_v25  ;;  %v562_v29 = vand.u32 4294901760, %v542_v26  ;;  %v939_v25 = vld [vmem:[%s1263_s2] ss:$0 sm:$0xff] }
  0xab   : > { %511 = vmatpush.msra.mxu2 %v436_v10 }
  0xac   : > { %290 = vmatpush.msra.mxu1 %v289_v28  ;;  %v589_v31 = vsub.f32 %v542_v26, %v562_v29 }
  0xad   : > { %292 = vmatmul.f32.vlgmr.msra.gmra.mxu1 %v261_v3  ;;  %364 = vmatmul.f32.vlgmr.msrb.gmra.mxu0 %v261_v3 }
  0xae   : > { %384 = vmatpush.msrb.mxu1 %v259_v17  ;;  %v590_v33 = vand.u32 4294901760, %v589_v31  ;;  %441 = vmatmul.f32.vlgmr.msrb.gmra.mxu3 %v410_v11 }
  0xaf   : > { %415 = vmatmul.f32.vlgmr.msrb.gmra.mxu2 %v414_v30  ;;  %563 = vmatpush.msrb.mxu0 %v562_v29 }
  0xb0   : > { %485 = vmatpush.msra.mxu1 %v408_v4  ;;  %v591_v34 = vsub.f32 %v589_v31, %v590_v33  ;;  %616 = vmatpush.msrb.mxu2 %v589_v31 }
  0xb1   : > { %639 = vmatpush.msrb.mxu3 %v562_v29 }
  0xb2   : > { %v592_v36 = vand.u32 4294901760, %v591_v34 }
  0xb5   : > { %386 = vmatmul.f32.vlgmr.msrb.gmra.mxu1 %v261_v3  ;;  %465 = vmatmul.f32.vlgmr.msra.gmra.mxu0 %v411_v14 }
  0xb6   : > { %665 = vmatpush.msra.mxu0 %v590_v33  ;;  %593 = vmatpush.msrb.mxu1 %v592_v36 }
  0xb7   : > { %513 = vmatmul.f32.vlgmr.msra.gmra.mxu2 %v410_v11  ;;  %535 = vmatmul.f32.vlgmr.msra.gmra.mxu3 %v410_v11 }
  0xbd   : > { %489 = vmatmul.f32.vlgmr.msra.gmra.mxu1 %v412_v19  ;;  %569 = vmatmul.f32.vlgmr.msrb.gmra.mxu0 %v568_v38 }
  0xbe   : > { %687 = vmatpush.msra.mxu1 %v562_v29 }
  0xbf   : > { %619 = vmatmul.f32.vlgmr.msrb.gmra.mxu2 %v565_v32  ;;  %643 = vmatmul.f32.vlgmr.msrb.gmra.mxu3 %v566_v35 }
  0xc5   : > { %595 = vmatmul.f32.vlgmr.msrb.gmra.mxu1 %v564_v27  ;;  %667 = vmatmul.f32.vlgmr.msra.gmra.mxu0 %v564_v27 }
  0xcd   : > { %689 = vmatmul.f32.vlgmr.msra.gmra.mxu1 %v564_v27  ;;  %v940_v27 = vld [vmem:[%s1264_s3] ss:$0 sm:$0xff] }
 0x122   : > { %v267_v39 = vpop.f32.mrf.mxu0 }
 0x128   : > { %v341_v40 = vpop.f32.mrf.mxu3 }
 0x12a   : > { %v293_v41 = vpop.f32.mrf.mxu1  ;;  %v317_v42 = vpop.f32.mrf.mxu2 }
 0x12b   : > { %v294_v43 = vadd.f32 %v293_v41, %v267_v39  ;;  %v365_v44 = vpop.f32.mrf.mxu0 }
 0x12d   : > { %v318_v45 = vadd.f32 %v317_v42, %v294_v43 }
 0x12f   : > { %v342_v46 = vadd.f32 %v341_v40, %v318_v45 }
 0x131   : > { %v366_v47 = vadd.f32 %v365_v44, %v342_v46  ;;  %v442_v48 = vpop.f32.mrf.mxu3 }
 0x132   : > { %v387_v49 = vpop.f32.mrf.mxu1  ;;  %v416_v50 = vpop.f32.mrf.mxu2 }
 0x133   : > { %v388_v51 = vadd.f32 %v387_v49, %v366_v47  ;;  %v466_v52 = vpop.f32.mrf.mxu0 }
 0x135   : > { %v417_v53 = vadd.f32 %v416_v50, %v388_v51 }
 0x137   : > { %v443_v56 = vadd.f32 %v442_v48, %v417_v53 }
 0x139   : > { %v467_v59 = vadd.f32 %v466_v52, %v443_v56 }
 0x13a   : > { %v490_v54 = vpop.f32.mrf.mxu1  ;;  %v514_v55 = vpop.f32.mrf.mxu2 }
 0x13b   : > { %v536_v57 = vpop.f32.mrf.mxu3  ;;  %v570_v58 = vpop.f32.mrf.mxu0  ;;  %v491_v62 = vadd.f32 %v490_v54, %v467_v59 }
 0x13d   : > { %v515_v3 = vadd.f32 %v514_v55, %v491_v62 }
 0x13f   : > { %v537_v7 = vadd.f32 %v536_v57, %v515_v3 }
 0x142   : > { %v596_v60 = vpop.f32.mrf.mxu1  ;;  %v620_v61 = vpop.f32.mrf.mxu2 }
 0x143   : > { %v597_v63 = vadd.f32 %v596_v60, %v570_v58  ;;  %v644_v0 = vpop.f32.mrf.mxu3  ;;  %v668_v2 = vpop.f32.mrf.mxu0 }
 0x145   : > { %v621_v1 = vadd.f32 %v620_v61, %v597_v63 }
 0x147   : > { %v645_v4 = vadd.f32 %v644_v0, %v621_v1 }
 0x149   : > { %v669_v5 = vadd.f32 %v668_v2, %v645_v4 }
 0x14a   : > { %v690_v6 = vpop.f32.mrf.mxu1 }
 0x14b   : > { %v691_v8 = vadd.f32 %v690_v6, %v669_v5 }
 0x14d   : > { %v693_v9 = vadd.f32 %v691_v8, %v537_v7 }
 0x14f   : > { %v695_v10 = vsel %vm694_vm1, %v693_v9, 0.0 }
 0x150   : > { %696 = vadd.xlane.f32.xlu1 %v695_v10 }
 0x1c3   : > { %v697_v11 = vpop.xlane.xlu1 %696 }
 0x1c4   : > { %v698_v12 = vmul.f32 0.0625, %v697_v11 }
 0x1c6   : > { %v699_v13 = vsub.f32 %v693_v9, %v698_v12 }
 0x1c8   : > { %v700_v14 = vmul.f32 %v699_v13, %v699_v13 }
 0x1ca   : > { %v701_v15 = vsel %vm694_vm1, %v700_v14, 0.0 }
 0x1cb   : > { %702 = vadd.xlane.f32.xlu1 %v701_v15 }
 0x23e   : > { %v703_v16 = vpop.xlane.xlu1 %702 }
 0x23f   : > { %v704_v17 = vmul.f32 0.0625, %v703_v16 }
 0x241   : > { %v705_v18 = vadd.f32 1e-05, %v704_v17 }
 0x243   : > { %941 = vrsqrt.f32 %v705_v18  ;;  %vm712_vm3 = vweird.f32 %v705_v18 }
 0x249   : > { %v942_v19 = vpop.eup %941 }
 0x24a   : > { %v707_v20 = vmul.f32 %v942_v19, %v705_v18  ;;  %vm713_vm2 = vweird.f32 %v942_v19 }
 0x24b   : > { %vm714_vm4 = vmor %vm712_vm3, %vm713_vm2 }
 0x24c   : > { %v708_v21 = vmul.f32 %v942_v19, %v707_v20 }
 0x24e   : > { %v709_v22 = vmul.f32 0.5, %v708_v21 }
 0x250   : > { %v710_v23 = vsub.f32 1.5, %v709_v22 }
 0x252   : > { %v711_v24 = vmul.f32 %v942_v19, %v710_v23 }
 0x254   : > { %v715_v26 = vsel %vm714_vm4, %v942_v19, %v711_v24 }
 0x255   : > { %v716_v28 = vmul.f32 %v715_v26, %v699_v13 }
 0x257   : > { %v721_v29 = vmul.f32 %v939_v25, %v716_v28 }
 0x259   : > { %v726_v30 = vadd.f32 %v940_v27, %v721_v29 }
 0x25b   : > { %v728_v31 = vmul.f32 0.70710677, %v726_v30  ;;  %v727_v62 = vmul.f32 0.5, %v726_v30 }
 0x25d   : > { %v729_v32 = vand.u32 2147483647, %v728_v31  ;;  %vm762_vm9 = vcmp.lt.f32.partialorder %v728_v31, 0.0 }
 0x25f   : > { %v730_v33 = vmul.f32 0.3275911, %v729_v32  ;;  %v756_v44 = vsub.f32 0.0, %v729_v32 }
 0x261   : > { %v731_v34 = vadd.f32 1.0, %v730_v33  ;;  %v757_v48 = vmul.f32 %v756_v44, %v729_v32 }
 0x263   : > { %943 = vrcp.f32 %v731_v34  ;;  %v743_v38 = vand.u32 2147483648, %v731_v34  ;;  %v741_v40 = vand.u32 2147483647, %v731_v34  ;;  %vm737_vm6 = vweird.f32 %v731_v34 }
 0x264   : > { %v758_v51 = vmul.f32 1.442695, %v757_v48 }
 0x265   : > { %v744_v42 = vor.u32 1.1754944e-38, %v743_v38  ;;  %vm742_vm8 = vcmp.eq.f32.partialorder %v741_v40, 8.507059e+37 }
 0x266   : > { %945 = vpow2.f32 %v758_v51 }
 0x269   : > { %v944_v35 = vpop.eup %943 }
 0x26a   : > { %v733_v36 = vmul.f32 %v944_v35, %v731_v34  ;;  %vm738_vm5 = vweird.f32 %v944_v35 }
 0x26b   : > { %vm739_vm7 = vmor %vm737_vm6, %vm738_vm5 }
 0x26c   : > { %v734_v37 = vsub.f32 1.0, %v733_v36  ;;  %v946_v57 = vpop.eup %945 }
 0x26e   : > { %v735_v39 = vmul.f32 %v944_v35, %v734_v37 }
 0x270   : > { %v736_v41 = vadd.f32 %v944_v35, %v735_v39 }
 0x272   : > { %v740_v43 = vsel %vm739_vm7, %v944_v35, %v736_v41 }
 0x273   : > { %v745_v45 = vsel %vm742_vm8, %v744_v42, %v740_v43 }
 0x274   : > { %v747_v46 = vmul.f32 1.0614054, %v745_v45 }
 0x276   : > { %v748_v47 = vadd.f32 -1.4531521, %v747_v46 }
 0x278   : > { %v749_v49 = vmul.f32 %v748_v47, %v745_v45 }
 0x27a   : > { %v750_v50 = vadd.f32 1.4214138, %v749_v49 }
 0x27c   : > { %v751_v52 = vmul.f32 %v750_v50, %v745_v45 }
 0x27e   : > { %v752_v53 = vadd.f32 -0.28449672, %v751_v52 }
 0x280   : > { %v753_v54 = vmul.f32 %v752_v53, %v745_v45 }
 0x282   : > { %v754_v55 = vadd.f32 0.2548296, %v753_v54 }
 0x284   : > { %v755_v56 = vmul.f32 %v754_v55, %v745_v45 }
 0x286   : > { %v760_v58 = vmul.f32 %v946_v57, %v755_v56 }
 0x288   : > { %v761_v59 = vsub.f32 1.0, %v760_v58 }
 0x28a   : > { %v763_v60 = vsub.f32 0.0, %v761_v59 }
 0x28c   : > { %v764_v61 = vsel %vm762_vm9, %v763_v60, %v761_v59 }
 0x28d   : > { %v765_v63 = vadd.f32 1.0, %v764_v61 }
 0x28f   : > { %v766_v0 = vmul.f32 %v765_v63, %v727_v62 }
 0x291   : > { %767 = vst.msk [vmem:[%s231_s11] sm:$0xff] %vm694_vm1, %v766_v0 }
 0x292   : > { %1034 = shalt.err (!%p1031_p9)
}
 0x293   : > { %884 = dma.vmem_to_hbm [thread:$0]  (%p1169_p13), %s782_s12, 128, %s784_s13, %s769_s22  }
 0x294 PF: > { %s795_s9 = sand.u32 1, %s1065_s15   ;;  %p1271_p10 = scmp.ge.s32.totalorder %s1077_s18, 2 }
 0x295   : > { %s796_s25 = scalar_lea.sflag [#allocation4], %s795_s9 }
 0x296   : > { %p895_p11 = pnand %p1271_p10, %p1174_p4 }
 0x298   : > { %p896_p0 = pneg %p895_p11 }
 0x29a   : > { %1060 = dma.done.wait (%p896_p0), %s796_s25, 128  }
 0x29b   : > { %1062 = vsyncadd (%p896_p0), %s796_s25, 4294967168  ;;  %p18_p2 = scmp.ge.s32.totalorder %s1149_s29, 4   ;;  %s1272_s15 = smov %s1069_s16 }
 0x29c   : > { %s1273_s16 = smov %s1073_s17  ;;  %s1274_s17 = smov %s1161_s6 }
 0x29d   : > { %s1275_s18 = smov %s1149_s29  ;;  %20 = sbr.rel (!%p18_p2) target bundleno = 6 (0x6), region = 87 }
 0x2a2   :  { %802 = vsyncpa [#allocation3], 1 }
 0x2a3   :  { %804 = vsyncpa [#allocation3 + $0x1], 1 }
 0x2a4   :  { %805 = vsyncpa [#allocation6], 1 }
 0x2a5   :  { %806 = vsyncpa [#allocation4], 1 }
 0x2a6   :  { %808 = vsyncpa [#allocation4 + $0x1], 1 }

</bundles_post_ra>
